<compile_context>
chip_gen: v5e
topology: v5e:2x2
jax: 0.10.0
libtpu: 0.0.40
codegen_flags: <defaults>
</compile_context>

<pallas_src>
import jax
import jax.numpy as jnp
from jax.experimental import pallas as pl
from jax.experimental.pallas import tpu as pltpu


def _make_kernel(S: int, OB: int, KR: int, use_halo: bool):
    def kernel(x_ref, h_ref, w_ref, o_ref):
        # x_ref : (1, S, XB)     x_ref[0][s, c] = x_pad[b, (t*OB + c)*S + s]
        # h_ref : (1, 1, S, HW)  halo columns c = OB .. OB+HW-1 of the same window
        # w_ref : (TF, KR*S)     conv filters, zero padded along K up to KR*S
        # o_ref : (1, TF, OB)    output tile (filters x time)
        w = w_ref[...]
        xa = x_ref[0]
        acc = jnp.dot(w[:, :S], xa[:, :OB], preferred_element_type=jnp.float32)
        if KR > 1:
            win = jnp.concatenate([xa, h_ref[0, 0]], axis=-1) if use_halo else xa
            for q in range(1, KR):
                acc = acc + jnp.dot(
                    w[:, q * S:(q + 1) * S], win[:, q:q + OB],
                    preferred_element_type=jnp.float32)
        o_ref[0] = acc.astype(o_ref.dtype)

    return kernel


def waveform_encoder_forward(x, weight, stride=None, padding=None, *,
                             tf_cap=512, tt_pref=2048):
    """Forward pass of WaveformEncoder (Conv1d, in_channels=1, bias=False).

    x:      (B, 1, T)  waveform in NCW layout (same as the torch module input).
    weight: (F, 1, K)  Conv1d weight.
    Returns (B, F, T_out) with T_out = (T + 2*padding - K)//stride + 1.

    tt_pref: preferred time tile (multiple of 128); 2048 is a good default on
             v5e/v6e, v7x tolerates 4096 within its 64 MiB VMEM.
    tf_cap:  max filter tile (multiple of 8); F <= tf_cap keeps all filters in
             one resident tile so the waveform is read from HBM exactly once.
    """
    B, c_in, T = x.shape
    assert c_in == 1, "WaveformEncoder uses in_channels=1"
    F, c_in_w, K = weight.shape
    assert c_in_w == 1
    S = int(stride) if stride is not None else K // 2
    P = int(padding) if padding is not None else (K - S + 1) // 2
    assert S > 0 and K > 0
    assert tt_pref % 128 == 0, "tt_pref must be a multiple of 128 (lane width)"
    assert tf_cap % 8 == 0, "tf_cap must be a multiple of 8 (sublane width)"

    T_out = (T + 2 * P - K) // S + 1
    assert T_out > 0, "input too short for this kernel_size/stride/padding"

    KR = -(-K // S)            # stride-sized chunks spanned by one kernel window
    KRS = KR * S
    HW = max(KR - 1, 1)        # halo width (columns of x3 past a time tile)

    # ---- tiling ---------------------------------------------------------------
    if T_out <= tt_pref:
        # Single time tile: every block covers its full (possibly ragged) dims,
        # so no alignment / partial-block handling is needed anywhere.
        OB, NT = T_out, 1
    else:
        OB, NT = tt_pref, pl.cdiv(T_out, tt_pref)   # OB multiple of 128 -> lane dense
    TF = F if F <= tf_cap else tf_cap
    NF = pl.cdiv(F, TF)
    use_halo = (NT > 1) and (KR > 1)

    Rtot = NT * OB + HW                  # stride-sized rows the kernel may touch
    XB = Rtot if NT == 1 else OB         # waveform block width (x3 columns)

    # ---- layout-only input prep (x touches HBM once: read x, write x3) --------
    x2d = x.reshape(B, T)
    L = Rtot * S
    xp = jnp.pad(x2d, ((0, 0), (P, max(0, L - P - T))))[:, :L]      # (B, L)
    x3 = xp.reshape(B, Rtot, S).transpose(0, 2, 1)                   # (B, S, Rtot)

    # Tiny per-time-tile halo: columns t*OB + OB .. t*OB + OB + HW - 1 of x3.
    cols = jnp.arange(NT)[:, None] * OB + OB + jnp.arange(HW)[None, :]   # (NT, HW)
    halo = jnp.transpose(x3[:, :, cols], (0, 2, 1, 3))                   # (B, NT, S, HW)

    # Filters, zero-padded along K up to KR*S so every q-chunk is full width.
    w_pad = jnp.pad(weight.reshape(F, K), ((0, 0), (0, KRS - K))).astype(x.dtype)

    kernel = _make_kernel(S, OB, KR, use_halo)

    itemsize = jnp.dtype(x.dtype).itemsize
    cost = pl.CostEstimate(
        flops=2 * B * F * K * T_out,
        transcendentals=0,
        bytes_accessed=(B * S * Rtot + B * NT * S * HW + F * KRS
                        + B * F * T_out) * itemsize,
    )

    out = pl.pallas_call(
        kernel,
        out_shape=jax.ShapeDtypeStruct((B, F, T_out), x.dtype),
        grid=(B, NT, NF),
        in_specs=[
            # Waveform tile: block index constant across the innermost (filter)
            # axis -> fetched from HBM exactly once per (batch, time) tile.
            pl.BlockSpec((1, S, XB), lambda b, t, f: (b, 0, t)),
            # Halo (tiny).
            pl.BlockSpec((1, 1, S, HW), lambda b, t, f: (b, t, 0, 0)),
            # Filters: effectively resident (index constant when NF == 1).
            pl.BlockSpec((TF, KRS), lambda b, t, f: (f, 0)),
        ],
        out_specs=pl.BlockSpec((1, TF, OB), lambda b, t, f: (b, f, t)),
        compiler_params=pltpu.CompilerParams(
            dimension_semantics=("parallel", "parallel", "parallel"),
        ),
        cost_estimate=cost,
    )(x3, halo, w_pad)

    return out


def _reference_conv(x, w, stride, padding):
    return jax.lax.conv_general_dilated(
        x, w,
        window_strides=(stride,),
        padding=[(padding, padding)],
        dimension_numbers=("NCH", "OIH", "NCH"),
        precision=jax.lax.Precision.HIGHEST,
    )


if __name__ == "__main__":
    key = jax.random.PRNGKey(0)
    kx, kw = jax.random.split(key)

    B = 2
    num_filters, kernel_size = 64, 16
    stride = kernel_size // 2                      # module default
    padding = (kernel_size - stride + 1) // 2      # module formula

    w = jax.random.normal(kw, (num_filters, 1, kernel_size), dtype=jnp.float32) * 0.1

    # Cases: single-tile fast path, the tiny original demo shape, and (with small
    # tile overrides) the multi-tile halo path with partial trailing time/filter tiles.
    cases = [
        (2048, {}),
        (128, {}),
        (2000, dict(tt_pref=128, tf_cap=32)),
    ]
    for T, overrides in cases:
        x = jax.random.normal(kx, (B, 1, T), dtype=jnp.float32)

        y = waveform_encoder_forward(x, w, stride, padding, **overrides)
        y = jax.block_until_ready(y)

        ref = _reference_conv(x, w, stride, padding)
        T_out = (T + 2 * padding - kernel_size) // stride + 1
        assert y.shape == (B, num_filters, T_out), (y.shape, (B, num_filters, T_out))
        assert y.dtype == x.dtype
        max_err = float(jnp.max(jnp.abs(y - ref)))
        assert jnp.allclose(y, ref, atol=1e-2, rtol=1e-2), f"T={T} max_err={max_err}"

    print("KERNEL_OK")
</pallas_src>

<mosaic_0001>
module attributes {stable_mosaic.version = 11 : i64} {
  func.func @kernel(%arg0: i32, %arg1: i32, %arg2: i32, %arg3: memref<1x8x257xf32, #tpu.memory_space<vmem>>, %arg4: memref<1x1x8x1xf32, #tpu.memory_space<vmem>>, %arg5: memref<64x16xf32, #tpu.memory_space<vmem>>, %arg6: memref<1x64x256xf32, #tpu.memory_space<vmem>>) attributes {dimension_semantics = [#tpu.dimension_semantics<parallel>, #tpu.dimension_semantics<parallel>, #tpu.dimension_semantics<parallel>], iteration_bounds = array<i64: 2, 1, 1>, scalar_prefetch = 0 : i64, scratch_operands = 0 : i64, tpu.core_type = #tpu.core_type<tc>, window_params = [{transform_indices = @transform_0, window_bounds = array<i64: 1, 8, 257>}, {transform_indices = @transform_1, window_bounds = array<i64: 1, 1, 8, 1>}, {transform_indices = @transform_2, window_bounds = array<i64: 64, 16>}, {transform_indices = @transform_3, window_bounds = array<i64: 1, 64, 256>}]} {
    %c0 = arith.constant 0 : index
    %c0_0 = arith.constant 0 : index
    %0 = vector.load %arg5[%c0, %c0_0] : memref<64x16xf32, #tpu.memory_space<vmem>>, vector<64x16xf32>
    %c0_1 = arith.constant 0 : index
    %c0_2 = arith.constant 0 : index
    %c0_3 = arith.constant 0 : index
    %1 = vector.load %arg3[%c0_1, %c0_2, %c0_3] : memref<1x8x257xf32, #tpu.memory_space<vmem>>, vector<1x8x257xf32>
    %2 = vector.shape_cast %1 : vector<1x8x257xf32> to vector<8x257xf32>
    %3 = vector.extract_strided_slice %0 {offsets = [0, 0], sizes = [64, 8], strides = [1, 1]} : vector<64x16xf32> to vector<64x8xf32>
    %4 = vector.extract_strided_slice %2 {offsets = [0, 0], sizes = [8, 256], strides = [1, 1]} : vector<8x257xf32> to vector<8x256xf32>
    %cst = arith.constant dense<0.000000e+00> : vector<64x256xf32>
    %5 = tpu.matmul %3, %4, %cst {dimension_numbers = #tpu.dot_dimension_numbers<[1], [0], [0], [1], [0, 0, 1, 1], [], []>} : vector<64x8xf32>, vector<8x256xf32>, vector<64x256xf32> -> vector<64x256xf32>
    %6 = vector.extract_strided_slice %0 {offsets = [0, 8], sizes = [64, 8], strides = [1, 1]} : vector<64x16xf32> to vector<64x8xf32>
    %7 = vector.extract_strided_slice %2 {offsets = [0, 1], sizes = [8, 256], strides = [1, 1]} : vector<8x257xf32> to vector<8x256xf32>
    %cst_4 = arith.constant dense<0.000000e+00> : vector<64x256xf32>
    %8 = tpu.matmul %6, %7, %cst_4 {dimension_numbers = #tpu.dot_dimension_numbers<[1], [0], [0], [1], [0, 0, 1, 1], [], []>} : vector<64x8xf32>, vector<8x256xf32>, vector<64x256xf32> -> vector<64x256xf32>
    %9 = arith.addf %5, %8 : vector<64x256xf32>
    %c0_5 = arith.constant 0 : index
    %c0_6 = arith.constant 0 : index
    %c0_7 = arith.constant 0 : index
    %10 = vector.load %arg6[%c0_5, %c0_6, %c0_7] : memref<1x64x256xf32, #tpu.memory_space<vmem>>, vector<1x64x256xf32>
    %11 = vector.shape_cast %10 : vector<1x64x256xf32> to vector<64x256xf32>
    %12 = vector.shape_cast %9 : vector<64x256xf32> to vector<1x64x256xf32>
    tpu.vector_store %arg6[%c0_5, %c0_6, %c0_7], %12 {strides = array<i32>} : memref<1x64x256xf32, #tpu.memory_space<vmem>>, vector<1x64x256xf32>,
    return
  }
  func.func @transform_0(%arg0: i32, %arg1: i32, %arg2: i32) -> (i32, i32, i32) {
    %c0_i32 = arith.constant 0 : i32
    %c0_i32_0 = arith.constant 0 : i32
    return %arg0, %c0_i32, %arg1 : i32, i32, i32
  }
  func.func @transform_1(%arg0: i32, %arg1: i32, %arg2: i32) -> (i32, i32, i32, i32) {
    %c0_i32 = arith.constant 0 : i32
    %c0_i32_0 = arith.constant 0 : i32
    %c0_i32_1 = arith.constant 0 : i32
    return %arg0, %arg1, %c0_i32, %c0_i32_0 : i32, i32, i32, i32
  }
  func.func @transform_2(%arg0: i32, %arg1: i32, %arg2: i32) -> (i32, i32) {
    %c0_i32 = arith.constant 0 : i32
    %c0_i32_0 = arith.constant 0 : i32
    return %arg2, %c0_i32 : i32, i32
  }
  func.func @transform_3(%arg0: i32, %arg1: i32, %arg2: i32) -> (i32, i32, i32) {
    %c0_i32 = arith.constant 0 : i32
    return %arg0, %arg2, %arg1 : i32, i32, i32
  }
}

</mosaic_0001>

<bundles_post_ra>
// kernel: tpu_custom_call.1
= control target key start
LH: loop header
LB: loop body
LE: loop exit
PB: predicated region body
PF: predicated region fallthrough
CT: control target
= control target key end

     0   :  { %8 = vsyncpa [#allocation3], 0  ;;  %s1048_s0 = inlined_call_operand.vmem [shape: f32[2,8,257], index: 0, kind: input, shape index: {}]   ;;  %s1049_s1 = inlined_call_operand.vmem [shape: f32[2,1,8,1], index: 1, kind: input, shape index: {}]   ;;  %s1050_s2 = inlined_call_operand.vmem [shape: f32[64,16], index: 2, kind: input, shape index: {}]   ;;  %s1051_s3 = inlined_call_operand.hbm [shape: f32[2,64,256], index: 3, kind: output, shape index: {}]  }
   0x1   :  { %10 = vsyncpa [#allocation3 + $0x1], 0  ;;  %s872_s12 = smov 0   ;;  %s874_s13 = smov 0  }
   0x2   :  { %s876_s14 = smov 0   ;;  %s878_s15 = smov 0  }
   0x3   :  { %s880_s16 = smov 0   ;;  %s882_s17 = smov 0  }
   0x4 LB: > { %s657_s1 = sadd.s32 4294967295, %s846_s17   ;;  %s658_s18 = sadd.s32 4294967294, %s846_s17   ;;  %s846_s17 = sphi %s882_s17, %s16_s17   ;;  %s842_s16 = sphi %s880_s16, %s1058_s16   ;;  %s838_s15 = sphi %s878_s15, %s1057_s15   ;;  %s834_s14 = sphi %s876_s14, %s1056_s14   ;;  %s830_s13 = sphi %s874_s13, %s1055_s13   ;;  %s826_s12 = sphi %s872_s12, %s1054_s12  }
   0x5   : > { %s35_s19 = sadd.s32 1, %s842_s16  ;;  %s128_s20 = sadd.s32 1, %s834_s14 }
   0x6   : > { %p37_p0 = scmp.ge.s32.totalorder %s35_s19, 2  ;;  %p138_p1 = scmp.ne.s32.totalorder %s834_s14, %s830_s13 }
   0x7   : > { %p139_p2 = scmp.eq.s32.totalorder %s657_s1, 1  ;;  %p144_p3 = scmp.ne.s32.totalorder %s830_s13, %s826_s12 }
   0x8   : > { %s1060_s19 = smov (%p37_p0, %s35_s19), 0  ;;  %p145_p5 = scmp.eq.s32.totalorder %s658_s18, 1 }
   0x9   : > { %p912_p4 = por %p139_p2, %p138_p1  ;;  %s121_s22 = ssub.s32 %s842_s16, %s1060_s19 }
   0xa   : > { %p662_p6 = scmp.ge.s32.totalorder %s846_s17, 1  ;;  %p126_p7 = scmp.eq.s32.totalorder %s121_s22, 0 }
   0xb   : > { %p919_p8 = por %p145_p5, %p144_p3  ;;  %p195_p9 = scmp.lt.s32.totalorder %s846_s17, 3 }
   0xc   : > { %s925_s24 = scalar_select %p126_p7, %s834_s14, %s128_s20  }
   0xd   : > { %p196_p10 = pnand %p662_p6, %p195_p9 }
   0xe   : > { %p236_p11 = scmp.lt.s32.totalorder (!%p196_p10), %s838_s15, 1  ;;  %s848_s30 = smov (!%p196_p10), 120  }
   0xf   : > { %199 = sbr.rel (%p196_p10) target bundleno = 341 (0x155), region = 32  ;;  %s849_s1 = smov (!%p196_p10), 127  }
  0x10   : > { %s702_s6 = sshll.u32 (!%p196_p10), %s838_s15, 7  ;;  %s788_s25 = scalar_lea.hbm (!%p196_p10), %s1051_s3, 256 }
  0x11   : > { %s539_s9 = scalar_lea.hbm (!%p196_p10), %s1051_s3, %s702_s6 }
  0x12   : > { %s542_s11 = sshll.u32 (!%p196_p10), %s539_s9, 4  ;;  %s543_s11 = int_to_ptr.hbm [resolvable:$true] %s542_s11 }
  0x14   : > { %v260_v0 = vld [vmem:[%s1050_s2] sm:$0xff]  ;;  %v262_v1 = vld [vmem:[%s1050_s2 + $0x10] sm:$0xff]  ;;  %s237_s29 = scalar_select %p236_p11, %s838_s15, 1  ;;  %v261_v4 = vld [vmem:[%s1050_s2 + $0x8] sm:$0xff]  ;;  %vm309_vm0 = vcmask 64512   ;;  %vm304_vm1 = vcmask 1039360  }
  0x15   : > { %279 = vrot.lane.b32.xlu1 %v260_v0, %s848_s30  ;;  %283 = vrot.lane.b32.xlu2 %v262_v1, %s848_s30  ;;  %v263_v6 = vld [vmem:[%s1050_s2 + $0x18] sm:$0xff]  ;;  %v265_v8 = vld [vmem:[%s1050_s2 + $0x28] sm:$0xff] }
  0x16   : > { %s703_s4 = smul.u32 24, %s237_s29  ;;  %v266_v9 = vld [vmem:[%s1050_s2 + $0x30] sm:$0xff]  ;;  %v264_v10 = vld [vmem:[%s1050_s2 + $0x20] sm:$0xff]  ;;  %v267_v11 = vld [vmem:[%s1050_s2 + $0x38] sm:$0xff] }
  0x18   : > { %s243_s7 = scalar_lea.vmem %s1048_s0, %s703_s4 }
  0x19   : > { %v268_v2 = vld [vmem:[%s243_s7] sm:$0xff]  ;;  %v269_v3 = vld [vmem:[%s243_s7 + $0x8] sm:$0xff]  ;;  %v270_v7 = vld [vmem:[%s243_s7 + $0x10] sm:$0xff] }
  0x1a   : > { %v763_v5 = vpack.i.bf16 %v269_v3, %v268_v2  ;;  %439 = vmatpush.msra.mxu2 %v268_v2  ;;  %480 = vmatpush.msra.mxu3 %v269_v3 }
  0x1b   : > { %681 = vmatmul.msk.f32.vlgmr.msra.gmra.mxu2 %vm309_vm0, %v260_v0  ;;  %689 = vmatmul.msk.f32.vlgmr.msra.gmra.mxu3 %vm309_vm0, %v260_v0 }
  0x1c   : > { %764 = vrot.lane.b32.xlu0 %v763_v5, %s849_s1 }
  0x1d   : > { %281 = vrot.lane.b32.xlu1 %v261_v4, %s848_s30  ;;  %285 = vrot.lane.b32.xlu2 %v263_v6, %s848_s30 }
  0x23   : > { %682 = vmatmul.msk.f32.gmra.mxu2 %vm309_vm0, %v261_v4  ;;  %690 = vmatmul.msk.f32.gmra.mxu3 %vm309_vm0, %v261_v4 }
  0x24   : > { %302 = vrot.lane.b32.xlu0 %v270_v7, %s849_s1  ;;  %s782_s1 = sshra.s32 %s543_s11, 4  ;;  %s783_s1 = int_to_ptr.hbm [resolvable:$true] %s782_s1 }
  0x25   : > { %289 = vrot.lane.b32.xlu1 %v265_v8, %s848_s30  ;;  %291 = vrot.lane.b32.xlu2 %v266_v9, %s848_s30  ;;  %s784_s18 = scalar_lea.hbm %s783_s1, 128  ;;  %p789_p1 = scmp.lt.s32.totalorder %s783_s1, %s1051_s3 }
  0x26   : > { %p785_p12 = scmp.ne.s32.totalorder %s783_s1, %s784_s18  ;;  %p790_p2 = scmp.lt.s32.totalorder %s788_s25, %s784_s18 }
  0x28   : > { %p786_p13 = pnand %p785_p12, %p912_p4  ;;  %p791_p3 = por %p790_p2, %p789_p1 }
  0x2a   : > { %p787_p0 = pneg %p786_p13 }
  0x2b   : > { %683 = vmatmul.msk.f32.gmra.mxu2 %vm309_vm0, %v262_v1  ;;  %691 = vmatmul.msk.f32.gmra.mxu3 %vm309_vm0, %v262_v1 }
  0x2c   : > { %287 = vrot.lane.b32.xlu0 %v264_v10, %s848_s30  ;;  %p792_p5 = pnand %p791_p3, %p787_p0 }
  0x33   : > { %684 = vmatmul.msk.f32.gmra.mxu2 %vm309_vm0, %v263_v6  ;;  %692 = vmatmul.msk.f32.gmra.mxu3 %vm309_vm0, %v263_v6 }
  0x34   : > { %293 = vrot.lane.b32.xlu0 %v267_v11, %s848_s30  ;;  %s232_s30 = sand.u32 1, %s830_s13  }
  0x35   : > { %s663_s4 = sshll.u32 %s232_s30, 7  ;;  %s523_s15 = scalar_lea.sflag [#allocation3], %s232_s30 }
  0x36   : > { %s991_s5 = scalar_lea.vmem [#allocation2], %s663_s4 }
  0x37   : > { %s540_s10 = sshll.u32 %s991_s5, 4  ;;  %s541_s10 = int_to_ptr.vmem [resolvable:$true] %s540_s10 }
  0x3b   : > { %685 = vmatmul.msk.f32.gmra.mxu2 %vm309_vm0, %v264_v10  ;;  %693 = vmatmul.msk.f32.gmra.mxu3 %vm309_vm0, %v264_v10 }
  0x43   : > { %686 = vmatmul.msk.f32.gmra.mxu2 %vm309_vm0, %v265_v8  ;;  %694 = vmatmul.msk.f32.gmra.mxu3 %vm309_vm0, %v265_v8 }
  0x4b   : > { %687 = vmatmul.msk.f32.gmra.mxu2 %vm309_vm0, %v266_v9  ;;  %695 = vmatmul.msk.f32.gmra.mxu3 %vm309_vm0, %v266_v9 }
  0x53   : > { %688 = vmatmul.msk.f32.gmra.mxu2 %vm309_vm0, %v267_v11  ;;  %696 = vmatmul.msk.f32.gmra.mxu3 %vm309_vm0, %v267_v11 }
  0x6f   : > { %v284_v20 = vpop.permute.xlu2 %283 }
  0x77   : > { %v286_v21 = vpop.permute.xlu2 %285 }
  0x7f   : > { %v292_v24 = vpop.permute.xlu2 %291 }
  0x87   : > { %v280_v13 = vpop.permute.xlu1 %279 }
  0x8e   : > { %v765_v12 = vpop.permute.xlu0 %764 }
  0x8f   : > { %v767_v14 = vunpack.i.h.bf16 %v765_v12  ;;  %v766_v15 = vunpack.i.l.bf16 %v765_v12  ;;  %v282_v19 = vpop.permute.xlu1 %281 }
  0x91   : > { %v305_v16 = vsel %vm304_vm1, %v766_v15, %v767_v14 }
  0x92   : > { %341 = vmatpush.msra.mxu0 %v305_v16 }
  0x93   : > { %665 = vmatmul.msk.f32.vlgmr.msra.gmra.mxu0 %vm309_vm0, %v280_v13 }
  0x96   : > { %v303_v17 = vpop.permute.xlu0 %302 }
  0x97   : > { %v306_v18 = vsel %vm304_vm1, %v767_v14, %v303_v17  ;;  %v290_v23 = vpop.permute.xlu1 %289 }
  0x98   : > { %382 = vmatpush.msra.mxu1 %v306_v18 }
  0x99   : > { %673 = vmatmul.msk.f32.vlgmr.msra.gmra.mxu1 %vm309_vm0, %v280_v13 }
  0x9b   : > { %666 = vmatmul.msk.f32.gmra.mxu0 %vm309_vm0, %v282_v19 }
  0x9e   : > { %v288_v22 = vpop.permute.xlu0 %287  ;;  %v441_v26 = vpop.f32.mrf.mxu2 }
  0x9f   : > { %v482_v27 = vpop.f32.mrf.mxu3 }
  0xa1   : > { %674 = vmatmul.msk.f32.gmra.mxu1 %vm309_vm0, %v282_v19 }
  0xa3   : > { %667 = vmatmul.msk.f32.gmra.mxu0 %vm309_vm0, %v284_v20 }
  0xa6   : > { %v294_v25 = vpop.permute.xlu0 %293  ;;  %v444_v28 = vpop.f32.mrf.mxu2 }
  0xa7   : > { %v485_v30 = vpop.f32.mrf.mxu3 }
  0xa9   : > { %675 = vmatmul.msk.f32.gmra.mxu1 %vm309_vm0, %v284_v20 }
  0xab   : > { %668 = vmatmul.msk.f32.gmra.mxu0 %vm309_vm0, %v286_v21 }
  0xae   : > { %v447_v32 = vpop.f32.mrf.mxu2 }
  0xaf   : > { %v488_v37 = vpop.f32.mrf.mxu3 }
  0xb1   : > { %676 = vmatmul.msk.f32.gmra.mxu1 %vm309_vm0, %v286_v21 }
  0xb3   : > { %669 = vmatmul.msk.f32.gmra.mxu0 %vm309_vm0, %v288_v22 }
  0xb6   : > { %v450_v39 = vpop.f32.mrf.mxu2 }
  0xb7   : > { %v491_v43 = vpop.f32.mrf.mxu3 }
  0xb9   : > { %677 = vmatmul.msk.f32.gmra.mxu1 %vm309_vm0, %v288_v22 }
  0xbb   : > { %670 = vmatmul.msk.f32.gmra.mxu0 %vm309_vm0, %v290_v23 }
  0xbe   : > { %v453_v47 = vpop.f32.mrf.mxu2 }
  0xbf   : > { %v494_v50 = vpop.f32.mrf.mxu3 }
  0xc1   : > { %678 = vmatmul.msk.f32.gmra.mxu1 %vm309_vm0, %v290_v23 }
  0xc3   : > { %671 = vmatmul.msk.f32.gmra.mxu0 %vm309_vm0, %v292_v24 }
  0xc6   : > { %v456_v54 = vpop.f32.mrf.mxu2 }
  0xc7   : > { %v497_v58 = vpop.f32.mrf.mxu3 }
  0xc9   : > { %679 = vmatmul.msk.f32.gmra.mxu1 %vm309_vm0, %v292_v24 }
  0xcb   : > { %672 = vmatmul.msk.f32.gmra.mxu0 %vm309_vm0, %v294_v25 }
  0xce   : > { %v459_v60 = vpop.f32.mrf.mxu2 }
  0xcf   : > { %v500_v1 = vpop.f32.mrf.mxu3 }
  0xd1   : > { %680 = vmatmul.msk.f32.gmra.mxu1 %vm309_vm0, %v294_v25 }
  0xd6   : > { %v462_v3 = vpop.f32.mrf.mxu2 }
  0xd7   : > { %v503_v7 = vpop.f32.mrf.mxu3 }
 0x110   : > { %v343_v29 = vpop.f32.mrf.mxu0 }
 0x111   : > { %v442_v31 = vadd.f32 %v441_v26, %v343_v29 }
 0x113   : > { %506 = vst [vmem:[%s991_s5] sm:$0xff] %v442_v31 }
 0x116   : > { %v384_v33 = vpop.f32.mrf.mxu1 }
 0x117   : > { %v483_v34 = vadd.f32 %v482_v27, %v384_v33 }
 0x118   : > { %v346_v35 = vpop.f32.mrf.mxu0 }
 0x119   : > { %507 = vst [vmem:[%s991_s5 + $0x8] sm:$0xff] %v483_v34  ;;  %v445_v36 = vadd.f32 %v444_v28, %v346_v35 }
 0x11b   : > { %508 = vst [vmem:[%s991_s5 + $0x10] sm:$0xff] %v445_v36 }
 0x11e   : > { %v387_v38 = vpop.f32.mrf.mxu1 }
 0x11f   : > { %v486_v40 = vadd.f32 %v485_v30, %v387_v38 }
 0x120   : > { %v349_v41 = vpop.f32.mrf.mxu0 }
 0x121   : > { %509 = vst [vmem:[%s991_s5 + $0x18] sm:$0xff] %v486_v40  ;;  %v448_v42 = vadd.f32 %v447_v32, %v349_v41 }
 0x123   : > { %510 = vst [vmem:[%s991_s5 + $0x20] sm:$0xff] %v448_v42 }
 0x126   : > { %v390_v44 = vpop.f32.mrf.mxu1 }
 0x127   : > { %v489_v45 = vadd.f32 %v488_v37, %v390_v44 }
 0x128   : > { %v352_v46 = vpop.f32.mrf.mxu0 }
 0x129   : > { %511 = vst [vmem:[%s991_s5 + $0x28] sm:$0xff] %v489_v45  ;;  %v451_v48 = vadd.f32 %v450_v39, %v352_v46 }
 0x12b   : > { %512 = vst [vmem:[%s991_s5 + $0x30] sm:$0xff] %v451_v48 }
 0x12e   : > { %v393_v49 = vpop.f32.mrf.mxu1 }
 0x12f   : > { %v492_v51 = vadd.f32 %v491_v43, %v393_v49 }
 0x130   : > { %v355_v52 = vpop.f32.mrf.mxu0 }
 0x131   : > { %513 = vst [vmem:[%s991_s5 + $0x38] sm:$0xff] %v492_v51  ;;  %v454_v53 = vadd.f32 %v453_v47, %v355_v52 }
 0x133   : > { %514 = vst [vmem:[%s991_s5 + $0x40] sm:$0xff] %v454_v53 }
 0x136   : > { %v396_v55 = vpop.f32.mrf.mxu1 }
 0x137   : > { %v495_v56 = vadd.f32 %v494_v50, %v396_v55 }
 0x138   : > { %v358_v57 = vpop.f32.mrf.mxu0 }
 0x139   : > { %515 = vst [vmem:[%s991_s5 + $0x48] sm:$0xff] %v495_v56  ;;  %v457_v59 = vadd.f32 %v456_v54, %v358_v57 }
 0x13b   : > { %516 = vst [vmem:[%s991_s5 + $0x50] sm:$0xff] %v457_v59 }
 0x13e   : > { %v399_v61 = vpop.f32.mrf.mxu1 }
 0x13f   : > { %v498_v62 = vadd.f32 %v497_v58, %v399_v61 }
 0x140   : > { %v361_v63 = vpop.f32.mrf.mxu0 }
 0x141   : > { %517 = vst [vmem:[%s991_s5 + $0x58] sm:$0xff] %v498_v62  ;;  %v460_v0 = vadd.f32 %v459_v60, %v361_v63 }
 0x143   : > { %518 = vst [vmem:[%s991_s5 + $0x60] sm:$0xff] %v460_v0 }
 0x146   : > { %v402_v2 = vpop.f32.mrf.mxu1 }
 0x147   : > { %v501_v4 = vadd.f32 %v500_v1, %v402_v2 }
 0x148   : > { %v364_v5 = vpop.f32.mrf.mxu0 }
 0x149   : > { %519 = vst [vmem:[%s991_s5 + $0x68] sm:$0xff] %v501_v4  ;;  %v463_v6 = vadd.f32 %v462_v3, %v364_v5 }
 0x14b   : > { %520 = vst [vmem:[%s991_s5 + $0x70] sm:$0xff] %v463_v6 }
 0x14e   : > { %v405_v8 = vpop.f32.mrf.mxu1 }
 0x14f   : > { %v504_v9 = vadd.f32 %v503_v7, %v405_v8 }
 0x151   : > { %521 = vst [vmem:[%s991_s5 + $0x78] sm:$0xff] %v504_v9 }
 0x152   : > { %795 = shalt.err (!%p792_p5)
}
 0x153   : > { %s850_s28 = smov 256   ;;  %s851_s29 = smov 16  }
 0x154   : > { %704 = dma.vmem_to_hbm [thread:$0]  (%p912_p4), %s541_s10, 2048, %s543_s11, %s523_s15, %s850_s28, %s850_s28, %s851_s29  }
 0x155 PF: > { %p710_p6 = scmp.ge.s32.totalorder %s846_s17, 2  ;;  %s557_s30 = sand.u32 1, %s826_s12  }
 0x156   : > { %s558_s4 = scalar_lea.sflag [#allocation3], %s557_s30 }
 0x157   : > { %p707_p7 = pnand %p710_p6, %p919_p8 }
 0x159   : > { %p708_p9 = pneg %p707_p7 }
 0x15b   : > { %821 = dma.done.wait (%p708_p9), %s558_s4, 2048  }
 0x15c   : > { %823 = vsyncadd (%p708_p9), %s558_s4, 4294965248  ;;  %s16_s17 = sadd.s32 1, %s846_s17   ;;  %s1054_s12 = smov %s830_s13 }
 0x15d   : > { %p13_p10 = scmp.ge.s32.totalorder %s16_s17, 4   ;;  %s1055_s13 = smov %s834_s14 }
 0x15e   : > { %s1056_s14 = smov %s925_s24  ;;  %s1057_s15 = smov %s842_s16 }
 0x15f   : > { %s1058_s16 = smov %s1060_s19  ;;  %15 = sbr.rel (!%p13_p10) target bundleno = 4 (0x4), region = 73 }
 0x164   :  { %564 = vsyncpa [#allocation3], 1 }
 0x165   :  { %566 = vsyncpa [#allocation3 + $0x1], 1 }

</bundles_post_ra>
